<compile_context>
chip_gen: v7x
topology: tpu7x:2x2x1
jax: 0.10.0
libtpu: 0.0.40
codegen_flags: <defaults>
</compile_context>

<pallas_src>
import functools
import math

import jax
import jax.numpy as jnp
from jax.experimental import pallas as pl
from jax.experimental.pallas import tpu as pltpu


# ----------------------------- helpers --------------------------------------

def _round_up(n, m):
    return ((n + m - 1) // m) * m


def _pad2(x, rows, cols, fill=0.0, dtype=None):
    dtype = dtype or x.dtype
    out = jnp.full((rows, cols), fill, dtype)
    return out.at[: x.shape[0], : x.shape[1]].set(x.astype(dtype))


def _choose_tiles(n128, row_tile, k_tile):
    """Lane/sublane-aligned (tr, tk) with a padded node count they both divide."""
    tr = max(128, (min(row_tile, n128) // 128) * 128)
    tk = max(128, (min(k_tile, n128) // 128) * 128)
    n_pad = _round_up(n128, math.lcm(tr, tk))
    # v7x megacore: give both TensorCores at least one row tile when possible.
    if n_pad // tr < 2 and n_pad >= 256:
        tr = max(128, (n_pad // 2 // 128) * 128)
        if n_pad % tr != 0:
            tr = 128
    return n_pad, tr, tk


def _vmem_limit(est_bytes):
    # headroom for Mosaic internal scratch; stay under v7x's 64 MiB / TC.
    return int(min(max(est_bytes + (8 << 20), 24 << 20), 56 << 20))


_X_RESIDENT_BUDGET = 12 << 20   # bytes allowed for the (double-buffered) resident X


def _sparsity_meta(edge_index, n_pad, tr, tk):
    """Per row tile: compacted nonzero A k-tile ids + counts (for scalar prefetch)."""
    src = edge_index[0].astype(jnp.int32)
    dst = edge_index[1].astype(jnp.int32)
    nrt, nkt = n_pad // tr, n_pad // tk
    mask = jnp.zeros((nrt, nkt), jnp.bool_).at[dst // tr, src // tk].set(True)
    nnz = jnp.sum(mask, axis=1).astype(jnp.int32)
    max_nnz = max(int(jnp.max(nnz)), 1)          # static (metadata built outside jit)
    # nonzero k-tile columns first (ascending k), zero columns pushed to the back
    order = jnp.argsort(jnp.where(mask, jnp.arange(nkt, dtype=jnp.int32)[None, :], nkt),
                        axis=1)
    ids = order[:, :max_nnz].astype(jnp.int32)
    # clamp padded entries to the last valid id -> same block index -> no extra DMA
    s_idx = jnp.arange(max_nnz, dtype=jnp.int32)[None, :]
    last = jnp.maximum(nnz - 1, 0)[:, None]
    ids = jnp.take_along_axis(ids, jnp.minimum(s_idx, last), axis=1)
    ids = jnp.where(nnz[:, None] > 0, ids, 0).astype(jnp.int32)
    return ids, nnz, max_nnz


# ----------------------------- kernels --------------------------------------

def _gconv_kernel(ids_ref, cnt_ref, a_ref, xsrc_ref, xr_ref, wr_ref, ws_ref, b_ref,
                  out_ref, acc_ref, *, tk, resident_src):
    i = pl.program_id(0)
    s = pl.program_id(1)

    @pl.when(s == 0)
    def _():
        acc_ref[...] = jnp.zeros_like(acc_ref)

    # neighbor aggregation over nonzero A tiles only: acc += A[i, kt] @ X[kt]
    @pl.when(s < cnt_ref[i])
    def _():
        if resident_src:
            start = pl.multiple_of(ids_ref[i, s] * tk, tk)
            xk = xsrc_ref[pl.ds(start, tk), :]
        else:
            xk = xsrc_ref[...]
        acc_ref[...] += jnp.dot(a_ref[...], xk, preferred_element_type=jnp.float32)

    @pl.when(s == pl.num_programs(1) - 1)
    def _():
        h = (jnp.dot(acc_ref[...].astype(jnp.bfloat16), wr_ref[...],
                     preferred_element_type=jnp.float32)
             + jnp.dot(xr_ref[...], ws_ref[...], preferred_element_type=jnp.float32)
             + b_ref[...])
        out_ref[...] = jnp.maximum(h, 0.0).astype(out_ref.dtype)   # ReLU (f32 VPU)


def _gconv3_head_kernel(ids_ref, cnt_ref, a_ref, x2src_ref, x2r_ref, x1r_ref,
                        w3r_ref, w3s_ref, b3_ref,
                        wl1_ref, wl2_ref, wl3_ref, bl_ref,
                        out_ref, acc_ref, *, tk, resident_src):
    i = pl.program_id(0)
    s = pl.program_id(1)

    @pl.when(s == 0)
    def _():
        acc_ref[...] = jnp.zeros_like(acc_ref)

    @pl.when(s < cnt_ref[i])
    def _():
        if resident_src:
            start = pl.multiple_of(ids_ref[i, s] * tk, tk)
            xk = x2src_ref[pl.ds(start, tk), :]
        else:
            xk = x2src_ref[...]
        acc_ref[...] += jnp.dot(a_ref[...], xk, preferred_element_type=jnp.float32)

    @pl.when(s == pl.num_programs(1) - 1)
    def _():
        # layer 3
        x3 = (jnp.dot(acc_ref[...].astype(jnp.bfloat16), w3r_ref[...],
                      preferred_element_type=jnp.float32)
              + jnp.dot(x2r_ref[...], w3s_ref[...], preferred_element_type=jnp.float32)
              + b3_ref[...])
        x3 = jnp.maximum(x3, 0.0)
        # split linear: cat([x1,x2,x3]) @ W_lin == x1@Wl1 + x2@Wl2 + x3@Wl3 (no concat)
        logits = (jnp.dot(x1r_ref[...], wl1_ref[...], preferred_element_type=jnp.float32)
                  + jnp.dot(x2r_ref[...], wl2_ref[...], preferred_element_type=jnp.float32)
                  + jnp.dot(x3.astype(jnp.bfloat16), wl3_ref[...],
                            preferred_element_type=jnp.float32)
                  + bl_ref[...])          # padded lanes hold -1e9 -> drop out below
        m = jnp.max(logits, axis=-1, keepdims=True)
        z = logits - m
        lse = jnp.log(jnp.sum(jnp.exp(z), axis=-1, keepdims=True))
        out_ref[...] = z - lse


# --------------------------- pallas_call wrappers ----------------------------

def _gconv(ids, cnt, A, x, wr, ws, b, *, tr, tk, max_nnz):
    n_pad, cin = x.shape
    h = wr.shape[1]
    grid = (n_pad // tr, max_nnz)

    resident = (2 * n_pad * cin * 2) <= _X_RESIDENT_BUDGET
    if resident:
        xsrc_spec = pl.BlockSpec((n_pad, cin), lambda i, s, idr, cntr: (0, 0))
        xsrc_bytes = n_pad * cin * 2
    else:
        xsrc_spec = pl.BlockSpec((tk, cin), lambda i, s, idr, cntr: (idr[i, s], 0))
        xsrc_bytes = tk * cin * 2

    est = (2 * tr * tk * 2                  # A tile, double-buffered bf16
           + 2 * xsrc_bytes                 # message-source X buffers
           + 2 * tr * cin * 2               # root-term row tile
           + 2 * (2 * cin * h * 2 + h * 4)  # W_rel, W_root (bf16) + bias (f32)
           + 2 * tr * h * 2                 # output block (bf16)
           + tr * cin * 4)                  # f32 accumulator scratch

    return pl.pallas_call(
        functools.partial(_gconv_kernel, tk=tk, resident_src=resident),
        out_shape=jax.ShapeDtypeStruct((n_pad, h), jnp.bfloat16),
        grid_spec=pltpu.PrefetchScalarGridSpec(
            num_scalar_prefetch=2,
            grid=grid,
            in_specs=[
                pl.BlockSpec((tr, tk), lambda i, s, idr, cntr: (i, idr[i, s])),  # A (sparse)
                xsrc_spec,                                                       # X (messages)
                pl.BlockSpec((tr, cin), lambda i, s, idr, cntr: (i, 0)),         # X (root)
                pl.BlockSpec((cin, h), lambda i, s, idr, cntr: (0, 0)),          # W_rel
                pl.BlockSpec((cin, h), lambda i, s, idr, cntr: (0, 0)),          # W_root
                pl.BlockSpec((1, h), lambda i, s, idr, cntr: (0, 0)),            # bias
            ],
            out_specs=pl.BlockSpec((tr, h), lambda i, s, idr, cntr: (i, 0)),
            scratch_shapes=[pltpu.VMEM((tr, cin), jnp.float32)],
        ),
        compiler_params=pltpu.CompilerParams(
            dimension_semantics=("parallel", "arbitrary"),
            vmem_limit_bytes=_vmem_limit(est)),
    )(ids, cnt, A, x, x, wr, ws, b)


def _gconv3_head(ids, cnt, A, x2, x1, w3r, w3s, b3, wl1, wl2, wl3, bl,
                 *, tr, tk, max_nnz):
    n_pad, h = x2.shape
    cout = wl1.shape[1]
    grid = (n_pad // tr, max_nnz)

    resident = (2 * n_pad * h * 2) <= _X_RESIDENT_BUDGET
    if resident:
        x2src_spec = pl.BlockSpec((n_pad, h), lambda i, s, idr, cntr: (0, 0))
        x2src_bytes = n_pad * h * 2
    else:
        x2src_spec = pl.BlockSpec((tk, h), lambda i, s, idr, cntr: (idr[i, s], 0))
        x2src_bytes = tk * h * 2

    est = (2 * tr * tk * 2
           + 2 * x2src_bytes
           + 4 * tr * h * 2                                         # x2 row + x1 row tiles
           + 2 * ((2 * h * h + 3 * h * cout) * 2 + (h + cout) * 4)  # weights + biases
           + 2 * tr * cout * 4                                      # f32 output block
           + tr * h * 4)                                            # accumulator scratch

    return pl.pallas_call(
        functools.partial(_gconv3_head_kernel, tk=tk, resident_src=resident),
        out_shape=jax.ShapeDtypeStruct((n_pad, cout), jnp.float32),
        grid_spec=pltpu.PrefetchScalarGridSpec(
            num_scalar_prefetch=2,
            grid=grid,
            in_specs=[
                pl.BlockSpec((tr, tk), lambda i, s, idr, cntr: (i, idr[i, s])),  # A (sparse)
                x2src_spec,                                                      # x2 (messages)
                pl.BlockSpec((tr, h), lambda i, s, idr, cntr: (i, 0)),           # x2 row tile
                pl.BlockSpec((tr, h), lambda i, s, idr, cntr: (i, 0)),           # x1 row tile
                pl.BlockSpec((h, h), lambda i, s, idr, cntr: (0, 0)),            # W3_rel
                pl.BlockSpec((h, h), lambda i, s, idr, cntr: (0, 0)),            # W3_root
                pl.BlockSpec((1, h), lambda i, s, idr, cntr: (0, 0)),            # b3
                pl.BlockSpec((h, cout), lambda i, s, idr, cntr: (0, 0)),         # W_lin[:H]
                pl.BlockSpec((h, cout), lambda i, s, idr, cntr: (0, 0)),         # W_lin[H:2H]
                pl.BlockSpec((h, cout), lambda i, s, idr, cntr: (0, 0)),         # W_lin[2H:3H]
                pl.BlockSpec((1, cout), lambda i, s, idr, cntr: (0, 0)),         # b_lin (-1e9 pad)
            ],
            out_specs=pl.BlockSpec((tr, cout), lambda i, s, idr, cntr: (i, 0)),
            scratch_shapes=[pltpu.VMEM((tr, h), jnp.float32)],
        ),
        compiler_params=pltpu.CompilerParams(
            dimension_semantics=("parallel", "arbitrary"),
            vmem_limit_bytes=_vmem_limit(est)),
    )(ids, cnt, A, x2, x2, x1, w3r, w3s, b3, wl1, wl2, wl3, bl)


# ------------------------------- forward -------------------------------------

def net_forward(x0, edge_index, edge_weight, params, *, row_tile=512, k_tile=1024):
    N, Cin = x0.shape
    H = params["w1_rel"].shape[1]
    Cout = params["w_lin"].shape[1]

    n128 = _round_up(max(N, 8), 128)
    n_pad, tr, tk = _choose_tiles(n128, row_tile, k_tile)
    cin_pad = _round_up(Cin, 128)
    h_pad = _round_up(H, 128)
    cout_pad = _round_up(Cout, 128)

    bf = jnp.bfloat16
    # dense padded adjacency built directly in bf16: A[dst, src] = w (no extra pad pass)
    # TODO(synk): fp8 A on v7x / int8+scale A on v5e,v6e would halve the dominant stream.
    src, dst = edge_index[0], edge_index[1]
    w = jnp.ones(src.shape, jnp.float32) if edge_weight is None else edge_weight
    A_p = jnp.zeros((n_pad, n_pad), bf).at[dst, src].add(w.astype(bf))

    x0_p = _pad2(x0, n_pad, cin_pad, dtype=bf)

    w1r = _pad2(params["w1_rel"], cin_pad, h_pad, dtype=bf)
    w1s = _pad2(params["w1_root"], cin_pad, h_pad, dtype=bf)
    b1 = _pad2(params["b1"].reshape(1, -1), 1, h_pad, dtype=jnp.float32)
    w2r = _pad2(params["w2_rel"], h_pad, h_pad, dtype=bf)
    w2s = _pad2(params["w2_root"], h_pad, h_pad, dtype=bf)
    b2 = _pad2(params["b2"].reshape(1, -1), 1, h_pad, dtype=jnp.float32)
    w3r = _pad2(params["w3_rel"], h_pad, h_pad, dtype=bf)
    w3s = _pad2(params["w3_root"], h_pad, h_pad, dtype=bf)
    b3 = _pad2(params["b3"].reshape(1, -1), 1, h_pad, dtype=jnp.float32)

    wl = params["w_lin"]                       # (3H, Cout)
    wl1 = _pad2(wl[0:H], h_pad, cout_pad, dtype=bf)
    wl2 = _pad2(wl[H:2 * H], h_pad, cout_pad, dtype=bf)
    wl3 = _pad2(wl[2 * H:3 * H], h_pad, cout_pad, dtype=bf)
    # padded logit lanes get a -1e9 bias so they drop out of the log_softmax
    bl = _pad2(params["b_lin"].reshape(1, -1), 1, cout_pad, fill=-1e9, dtype=jnp.float32)

    ids, cnt, max_nnz = _sparsity_meta(edge_index, n_pad, tr, tk)

    x1 = _gconv(ids, cnt, A_p, x0_p, w1r, w1s, b1, tr=tr, tk=tk, max_nnz=max_nnz)
    # dropout(p=0.2, training=False) -> identity
    x2 = _gconv(ids, cnt, A_p, x1, w2r, w2s, b2, tr=tr, tk=tk, max_nnz=max_nnz)
    out_pad = _gconv3_head(ids, cnt, A_p, x2, x1, w3r, w3s, b3, wl1, wl2, wl3, bl,
                           tr=tr, tk=tk, max_nnz=max_nnz)
    return out_pad[:N, :Cout]


# --------------------------- reference / setup --------------------------------

def net_reference(x0, edge_index, edge_weight, params):
    N = x0.shape[0]
    src, dst = edge_index[0], edge_index[1]
    w = jnp.ones(src.shape, jnp.float32) if edge_weight is None else edge_weight
    A = jnp.zeros((N, N), jnp.float32).at[dst, src].add(w)

    def gconv(x, wr, ws, b):
        return jnp.maximum(A @ x @ wr + x @ ws + b, 0.0)

    x1 = gconv(x0, params["w1_rel"], params["w1_root"], params["b1"])
    x2 = gconv(x1, params["w2_rel"], params["w2_root"], params["b2"])
    x3 = gconv(x2, params["w3_rel"], params["w3_root"], params["b3"])
    logits = jnp.concatenate([x1, x2, x3], axis=-1) @ params["w_lin"] + params["b_lin"]
    return jax.nn.log_softmax(logits, axis=-1)


def init_params(key, in_channels, hidden_channels, out_channels, scale=0.1):
    ks = jax.random.split(key, 11)

    def w(k, shape):
        return jax.random.normal(k, shape, dtype=jnp.float32) * scale

    return {
        "w1_rel":  w(ks[0], (in_channels, hidden_channels)),
        "w1_root": w(ks[1], (in_channels, hidden_channels)),
        "b1":      w(ks[2], (1, hidden_channels)),
        "w2_rel":  w(ks[3], (hidden_channels, hidden_channels)),
        "w2_root": w(ks[4], (hidden_channels, hidden_channels)),
        "b2":      w(ks[5], (1, hidden_channels)),
        "w3_rel":  w(ks[6], (hidden_channels, hidden_channels)),
        "w3_root": w(ks[7], (hidden_channels, hidden_channels)),
        "b3":      w(ks[8], (1, hidden_channels)),
        "w_lin":   w(ks[9], (3 * hidden_channels, out_channels)),
        "b_lin":   w(ks[10], (1, out_channels)),
    }


def _check(out, ref, n, cout, atol, rtol):
    assert out.shape == (n, cout)
    assert bool(jnp.all(jnp.isfinite(out)))
    assert bool(jnp.allclose(jnp.sum(jnp.exp(out), axis=-1), 1.0, atol=1e-5))
    assert bool(jnp.allclose(out, ref, atol=atol, rtol=rtol))


if __name__ == "__main__":
    key = jax.random.PRNGKey(0)
    in_channels, hidden, out_channels = 8, 32, 4

    # ---- test 1: tiny ring graph (single-tile path) -------------------------
    N1 = 16
    k_x, k_p, k_e, k_x2, k_p2, k_e2 = jax.random.split(key, 6)
    x0 = jax.random.normal(k_x, (N1, in_channels), dtype=jnp.float32)
    src = jnp.concatenate([jnp.arange(N1), jnp.array([0, 3, 7, 11])])
    dst = jnp.concatenate([(jnp.arange(N1) + 1) % N1, jnp.array([8, 12, 2, 5])])
    edge_index = jnp.stack([src, dst]).astype(jnp.int32)
    edge_weight = jnp.abs(jax.random.normal(k_e, (edge_index.shape[1],),
                                            dtype=jnp.float32)) + 0.5
    params = init_params(k_p, in_channels, hidden, out_channels)

    out1 = jax.block_until_ready(net_forward(x0, edge_index, edge_weight, params))
    ref1 = net_reference(x0, edge_index, edge_weight, params)
    _check(out1, ref1, N1, out_channels, atol=7e-2, rtol=7e-2)

    # ---- test 2: larger sparse graph (multi row/k tiles, skipped zero tiles) -
    N2 = 300
    x0b = jax.random.normal(k_x2, (N2, in_channels), dtype=jnp.float32)
    srcb = jnp.concatenate([jnp.arange(N2), jnp.arange(N2)])
    dstb = jnp.concatenate([(jnp.arange(N2) + 1) % N2, jnp.arange(N2) % 37])
    edge_index_b = jnp.stack([srcb, dstb]).astype(jnp.int32)
    edge_weight_b = 0.1 + 0.3 * jax.random.uniform(k_e2, (edge_index_b.shape[1],),
                                                   dtype=jnp.float32)
    params_b = init_params(k_p2, in_channels, hidden, out_channels, scale=0.08)

    out2 = jax.block_until_ready(net_forward(x0b, edge_index_b, edge_weight_b, params_b,
                                             row_tile=128, k_tile=128))
    ref2 = net_reference(x0b, edge_index_b, edge_weight_b, params_b)
    _check(out2, ref2, N2, out_channels, atol=1e-1, rtol=1e-1)

    print("KERNEL_OK")
</pallas_src>

<mosaic_0001>
module attributes {stable_mosaic.version = 11 : i64} {
  func.func @_gconv_kernel(%arg0: i32, %arg1: i32, %arg2: memref<1x1xi32, #tpu.memory_space<smem>>, %arg3: memref<1xi32, #tpu.memory_space<smem>>, %arg4: memref<128x128xbf16, #tpu.memory_space<vmem>>, %arg5: memref<128x128xbf16, #tpu.memory_space<vmem>>, %arg6: memref<128x128xbf16, #tpu.memory_space<vmem>>, %arg7: memref<128x128xbf16, #tpu.memory_space<vmem>>, %arg8: memref<128x128xbf16, #tpu.memory_space<vmem>>, %arg9: memref<1x128xf32, #tpu.memory_space<vmem>>, %arg10: memref<128x128xbf16, #tpu.memory_space<vmem>>, %arg11: memref<128x128xf32, #tpu.memory_space<vmem>>) attributes {dimension_semantics = [#tpu.dimension_semantics<parallel>, #tpu.dimension_semantics<arbitrary>], iteration_bounds = array<i64: 1, 1>, scalar_prefetch = 2 : i64, scratch_operands = 1 : i64, tpu.core_type = #tpu.core_type<tc>, window_params = [{transform_indices = @transform_0, window_bounds = array<i64: 128, 128>}, {pipeline_mode = #tpu.pipeline_mode<synchronous>, transform_indices = @transform_1, window_bounds = array<i64: 128, 128>}, {transform_indices = @transform_2, window_bounds = array<i64: 128, 128>}, {pipeline_mode = #tpu.pipeline_mode<synchronous>, transform_indices = @transform_3, window_bounds = array<i64: 128, 128>}, {pipeline_mode = #tpu.pipeline_mode<synchronous>, transform_indices = @transform_4, window_bounds = array<i64: 128, 128>}, {pipeline_mode = #tpu.pipeline_mode<synchronous>, transform_indices = @transform_5, window_bounds = array<i64: 1, 128>}, {transform_indices = @transform_6, window_bounds = array<i64: 128, 128>}]} {
    %c0_i32 = arith.constant 0 : i32
    %0 = arith.cmpi eq, %arg1, %c0_i32 : i32
    %1 = arith.extui %0 : i1 to i32
    %c0_i32_0 = arith.constant 0 : i32
    %2 = arith.cmpi ne, %1, %c0_i32_0 : i32
    scf.if %2 {
      %cst = arith.constant 0.000000e+00 : f32
      %11 = vector.broadcast %cst : f32 to vector<128x128xf32>
      %c0 = arith.constant 0 : index
      %c0_4 = arith.constant 0 : index
      %12 = vector.load %arg11[%c0, %c0_4] : memref<128x128xf32, #tpu.memory_space<vmem>>, vector<128x128xf32>
      tpu.vector_store %arg11[%c0, %c0_4], %11 {strides = array<i32>} : memref<128x128xf32, #tpu.memory_space<vmem>>, vector<128x128xf32>,
    } else {
    }
    %3 = arith.index_cast %arg0 : i32 to index
    %4 = memref.load %arg3[%3] : memref<1xi32, #tpu.memory_space<smem>>
    %5 = arith.cmpi slt, %arg1, %4 : i32
    %6 = arith.extui %5 : i1 to i32
    %c0_i32_1 = arith.constant 0 : i32
    %7 = arith.cmpi ne, %6, %c0_i32_1 : i32
    scf.if %7 {
      %11 = arith.index_cast %arg0 : i32 to index
      %12 = arith.index_cast %arg1 : i32 to index
      %13 = memref.load %arg2[%11, %12] : memref<1x1xi32, #tpu.memory_space<smem>>
      %c128_i32 = arith.constant 128 : i32
      %14 = arith.muli %13, %c128_i32 : i32
      %15 = tpu.assume_multiple %14, 128 : i32
      %16 = arith.index_cast %15 : i32 to index
      %c0 = arith.constant 0 : index
      %17 = vector.load %arg5[%16, %c0] : memref<128x128xbf16, #tpu.memory_space<vmem>>, vector<128x128xbf16>
      %c0_4 = arith.constant 0 : index
      %c0_5 = arith.constant 0 : index
      %18 = vector.load %arg11[%c0_4, %c0_5] : memref<128x128xf32, #tpu.memory_space<vmem>>, vector<128x128xf32>
      %c0_6 = arith.constant 0 : index
      %c0_7 = arith.constant 0 : index
      %19 = vector.load %arg4[%c0_6, %c0_7] : memref<128x128xbf16, #tpu.memory_space<vmem>>, vector<128x128xbf16>
      %cst = arith.constant dense<0.000000e+00> : vector<128x128xf32>
      %20 = tpu.matmul %19, %17, %cst {dimension_numbers = #tpu.dot_dimension_numbers<[1], [0], [0], [1], [0, 0, 1, 1], [], []>} : vector<128x128xbf16>, vector<128x128xbf16>, vector<128x128xf32> -> vector<128x128xf32>
      %21 = arith.addf %18, %20 : vector<128x128xf32>
      %c0_8 = arith.constant 0 : index
      %c0_9 = arith.constant 0 : index
      %22 = vector.load %arg11[%c0_8, %c0_9] : memref<128x128xf32, #tpu.memory_space<vmem>>, vector<128x128xf32>
      tpu.vector_store %arg11[%c0_8, %c0_9], %21 {strides = array<i32>} : memref<128x128xf32, #tpu.memory_space<vmem>>, vector<128x128xf32>,
    } else {
    }
    %c0_i32_2 = arith.constant 0 : i32
    %8 = arith.cmpi eq, %arg1, %c0_i32_2 : i32
    %9 = arith.extui %8 : i1 to i32
    %c0_i32_3 = arith.constant 0 : i32
    %10 = arith.cmpi ne, %9, %c0_i32_3 : i32
    scf.if %10 {
      %c0 = arith.constant 0 : index
      %c0_4 = arith.constant 0 : index
      %11 = vector.load %arg11[%c0, %c0_4] : memref<128x128xf32, #tpu.memory_space<vmem>>, vector<128x128xf32>
      %12 = arith.truncf %11 : vector<128x128xf32> to vector<128x128xbf16>
      %c0_5 = arith.constant 0 : index
      %c0_6 = arith.constant 0 : index
      %13 = vector.load %arg7[%c0_5, %c0_6] : memref<128x128xbf16, #tpu.memory_space<vmem>>, vector<128x128xbf16>
      %cst = arith.constant dense<0.000000e+00> : vector<128x128xf32>
      %14 = tpu.matmul %12, %13, %cst {dimension_numbers = #tpu.dot_dimension_numbers<[1], [0], [0], [1], [0, 0, 1, 1], [], []>} : vector<128x128xbf16>, vector<128x128xbf16>, vector<128x128xf32> -> vector<128x128xf32>
      %c0_7 = arith.constant 0 : index
      %c0_8 = arith.constant 0 : index
      %15 = vector.load %arg6[%c0_7, %c0_8] : memref<128x128xbf16, #tpu.memory_space<vmem>>, vector<128x128xbf16>
      %c0_9 = arith.constant 0 : index
      %c0_10 = arith.constant 0 : index
      %16 = vector.load %arg8[%c0_9, %c0_10] : memref<128x128xbf16, #tpu.memory_space<vmem>>, vector<128x128xbf16>
      %cst_11 = arith.constant dense<0.000000e+00> : vector<128x128xf32>
      %17 = tpu.matmul %15, %16, %cst_11 {dimension_numbers = #tpu.dot_dimension_numbers<[1], [0], [0], [1], [0, 0, 1, 1], [], []>} : vector<128x128xbf16>, vector<128x128xbf16>, vector<128x128xf32> -> vector<128x128xf32>
      %18 = arith.addf %14, %17 : vector<128x128xf32>
      %c0_12 = arith.constant 0 : index
      %c0_13 = arith.constant 0 : index
      %19 = vector.load %arg9[%c0_12, %c0_13] : memref<1x128xf32, #tpu.memory_space<vmem>>, vector<1x128xf32>
      %20 = vector.broadcast %19 : vector<1x128xf32> to vector<128x128xf32>
      %21 = arith.addf %18, %20 : vector<128x128xf32>
      %cst_14 = arith.constant 0.000000e+00 : f32
      %22 = vector.broadcast %cst_14 : f32 to vector<128x128xf32>
      %23 = arith.maximumf %21, %22 : vector<128x128xf32>
      %24 = arith.truncf %23 : vector<128x128xf32> to vector<128x128xbf16>
      %c0_15 = arith.constant 0 : index
      %c0_16 = arith.constant 0 : index
      %25 = vector.load %arg10[%c0_15, %c0_16] : memref<128x128xbf16, #tpu.memory_space<vmem>>, vector<128x128xbf16>
      tpu.vector_store %arg10[%c0_15, %c0_16], %24 {strides = array<i32>} : memref<128x128xbf16, #tpu.memory_space<vmem>>, vector<128x128xbf16>,
    } else {
    }
    return
  }
  func.func @transform_0(%arg0: i32, %arg1: i32, %arg2: memref<1x1xi32, #tpu.memory_space<smem>>, %arg3: memref<1xi32, #tpu.memory_space<smem>>) -> (i32, i32) {
    %0 = arith.index_cast %arg0 : i32 to index
    %1 = arith.index_cast %arg1 : i32 to index
    %2 = memref.load %arg2[%0, %1] : memref<1x1xi32, #tpu.memory_space<smem>>
    %c0_i32 = arith.constant 0 : i32
    return %arg0, %2 : i32, i32
  }
  func.func @transform_1(%arg0: i32, %arg1: i32, %arg2: memref<1x1xi32, #tpu.memory_space<smem>>, %arg3: memref<1xi32, #tpu.memory_space<smem>>) -> (i32, i32) {
    %c0_i32 = arith.constant 0 : i32
    %c0_i32_0 = arith.constant 0 : i32
    %c0_i32_1 = arith.constant 0 : i32
    return %c0_i32, %c0_i32_0 : i32, i32
  }
  func.func @transform_2(%arg0: i32, %arg1: i32, %arg2: memref<1x1xi32, #tpu.memory_space<smem>>, %arg3: memref<1xi32, #tpu.memory_space<smem>>) -> (i32, i32) {
    %c0_i32 = arith.constant 0 : i32
    %c0_i32_0 = arith.constant 0 : i32
    return %arg0, %c0_i32 : i32, i32
  }
  func.func @transform_3(%arg0: i32, %arg1: i32, %arg2: memref<1x1xi32, #tpu.memory_space<smem>>, %arg3: memref<1xi32, #tpu.memory_space<smem>>) -> (i32, i32) {
    %c0_i32 = arith.constant 0 : i32
    %c0_i32_0 = arith.constant 0 : i32
    %c0_i32_1 = arith.constant 0 : i32
    return %c0_i32, %c0_i32_0 : i32, i32
  }
  func.func @transform_4(%arg0: i32, %arg1: i32, %arg2: memref<1x1xi32, #tpu.memory_space<smem>>, %arg3: memref<1xi32, #tpu.memory_space<smem>>) -> (i32, i32) {
    %c0_i32 = arith.constant 0 : i32
    %c0_i32_0 = arith.constant 0 : i32
    %c0_i32_1 = arith.constant 0 : i32
    return %c0_i32, %c0_i32_0 : i32, i32
  }
  func.func @transform_5(%arg0: i32, %arg1: i32, %arg2: memref<1x1xi32, #tpu.memory_space<smem>>, %arg3: memref<1xi32, #tpu.memory_space<smem>>) -> (i32, i32) {
    %c0_i32 = arith.constant 0 : i32
    %c0_i32_0 = arith.constant 0 : i32
    %c0_i32_1 = arith.constant 0 : i32
    return %c0_i32, %c0_i32_0 : i32, i32
  }
  func.func @transform_6(%arg0: i32, %arg1: i32, %arg2: memref<1x1xi32, #tpu.memory_space<smem>>, %arg3: memref<1xi32, #tpu.memory_space<smem>>) -> (i32, i32) {
    %c0_i32 = arith.constant 0 : i32
    %c0_i32_0 = arith.constant 0 : i32
    return %arg0, %c0_i32 : i32, i32
  }
}

</mosaic_0001>

<bundles_post_ra>
// kernel: tpu_custom_call.1
= control target key start
LH: loop header
LB: loop body
LE: loop exit
PB: predicated region body
PF: predicated region fallthrough
CT: control target
= control target key end

     0   :  { %s1653_s0 = inlined_call_operand.<no memory space> [shape: s32[1,1], index: 0, kind: input, shape index: {}]   ;;  %s1654_s1 = inlined_call_operand.<no memory space> [shape: s32[1], index: 1, kind: input, shape index: {}]   ;;  %s1655_s2 = inlined_call_operand.hbm [shape: bf16[128,128], index: 2, kind: input, shape index: {}]   ;;  %s1656_s3 = inlined_call_operand.hbm [shape: bf16[128,128], index: 3, kind: input, shape index: {}]   ;;  %s1657_s4 = inlined_call_operand.hbm [shape: bf16[128,128], index: 4, kind: input, shape index: {}]   ;;  %s1658_s5 = inlined_call_operand.hbm [shape: bf16[128,128], index: 5, kind: input, shape index: {}]   ;;  %s1659_s6 = inlined_call_operand.hbm [shape: bf16[128,128], index: 6, kind: input, shape index: {}]   ;;  %s1660_s7 = inlined_call_operand.vmem [shape: f32[1,128], index: 7, kind: input, shape index: {}]   ;;  %s1661_s8 = inlined_call_operand.hbm [shape: bf16[128,128], index: 8, kind: output, shape index: {}]  }
   0x1   :  { %13 = sst [smem:[#allocation4]] %s1653_s0 }
   0x2   :  { %15 = vsyncpa [#allocation7], 0 }
   0x3   :  { %16 = vsyncpa [#allocation10], 0 }
   0x4   :  { %17 = vsyncpa [#allocation13], 0 }
   0x5   :  { %18 = vsyncpa [#allocation8], 0  ;;  %s1461_s29 = smov [#allocation9]   ;;  %s1462_s9 = smov [#allocation12]  }
   0x6   :  { %s42_s30 = sshll.u32 %s1461_s29, 4  ;;  %s66_s10 = sshll.u32 %s1462_s9, 4  ;;  %s43_s30 = int_to_ptr.vmem [resolvable:$true] %s42_s30  ;;  %s1518_s10 = int_to_ptr.vmem [resolvable:$true] %s66_s10 }
   0x7   :  { %s1319_s13 = scalar_lea.hbm %s1656_s3, 1024 }
   0x8   :  { %p1320_p0 = scmp.ne.s32.totalorder %s1656_s3, %s1319_s13  ;;  %p1323_p1 = scmp.lt.u32.totalorder %s1319_s13, %s1656_s3 }
   0xa   :  { %p1325_p2 = pnand %p1323_p1, %p1320_p0 }
   0xc   :  { %1328 = shalt.err (!%p1325_p2)
}
   0xd   :  { %s1329_s17 = scalar_lea.vmem %s43_s30, 1024  ;;  %p1334_p4 = scmp.lt.s32.totalorder %s43_s30, %s43_s30 }
   0xe   :  { %p1330_p3 = scmp.ne.s32.totalorder %s43_s30, %s1329_s17  ;;  %p1335_p5 = scmp.lt.s32.totalorder %s1329_s17, %s1329_s17 }
  0x10   :  { %p1336_p6 = por %p1335_p5, %p1334_p4 }
  0x12   :  { %p1337_p7 = pnand %p1336_p6, %p1330_p3 }
  0x14   :  { %1340 = shalt.err (!%p1337_p7)
}
  0x15   :  { %s1463_s18 = smov 64   ;;  %s1464_s19 = smov 4  }
  0x16   :  { %48 = dma.hbm_to_vmem [thread:$0]  %s1656_s3, 1024, %s43_s30, [#allocation10], %s1463_s18, %s1463_s18, %s1464_s19  }
  0x17   :  { %s1341_s24 = scalar_lea.hbm %s1658_s5, 1024 }
  0x18   :  { %p1342_p8 = scmp.ne.s32.totalorder %s1658_s5, %s1341_s24  ;;  %p1345_p9 = scmp.lt.u32.totalorder %s1341_s24, %s1658_s5 }
  0x1a   :  { %p1347_p10 = pnand %p1345_p9, %p1342_p8 }
  0x1c   :  { %1350 = shalt.err (!%p1347_p10)
}
  0x1d   :  { %s1351_s29 = scalar_lea.vmem %s1518_s10, 1024  ;;  %p1356_p12 = scmp.lt.s32.totalorder %s1518_s10, %s1518_s10 }
  0x1e   :  { %p1352_p11 = scmp.ne.s32.totalorder %s1518_s10, %s1351_s29  ;;  %p1357_p13 = scmp.lt.s32.totalorder %s1351_s29, %s1351_s29 }
  0x20   :  { %p1358_p0 = por %p1357_p13, %p1356_p12 }
  0x22   :  { %p1359_p1 = pnand %p1358_p0, %p1352_p11 }
  0x24   :  { %1362 = shalt.err (!%p1359_p1)
}
  0x25   :  { %72 = dma.hbm_to_vmem [thread:$0]  %s1658_s5, 1024, %s1518_s10, [#allocation13], %s1463_s18, %s1463_s18, %s1464_s19  }
  0x26   :  { %s24_s9 = sld [smem:[#allocation4]]  ;;  %s1465_s11 = smov [#allocation6]  }
  0x27   :  { %s30_s12 = sshll.u32 %s1465_s11, 4  ;;  %s1466_s13 = smov [#allocation11]   ;;  %s31_s12 = int_to_ptr.vmem [resolvable:$true] %s30_s12 }
  0x28   :  { %s54_s14 = sshll.u32 %s1466_s13, 4  ;;  %s1363_s16 = scalar_lea.hbm %s1657_s4, 1024  ;;  %s55_s14 = int_to_ptr.vmem [resolvable:$true] %s54_s14 }
  0x29   :  { %p1364_p2 = scmp.ne.s32.totalorder %s1657_s4, %s1363_s16  ;;  %p1367_p3 = scmp.lt.u32.totalorder %s1363_s16, %s1657_s4 }
  0x2b   :  { %p1369_p4 = pnand %p1367_p3, %p1364_p2 }
  0x2d   :  { %1372 = shalt.err (!%p1369_p4)
}
  0x2e   :  { %s1373_s5 = scalar_lea.vmem %s55_s14, 1024  ;;  %p1378_p6 = scmp.lt.s32.totalorder %s55_s14, %s55_s14 }
  0x2f   :  { %p1374_p5 = scmp.ne.s32.totalorder %s55_s14, %s1373_s5  ;;  %p1379_p7 = scmp.lt.s32.totalorder %s1373_s5, %s1373_s5 }
  0x31   :  { %p1380_p8 = por %p1379_p7, %p1378_p6 }
  0x33   :  { %p1381_p9 = pnand %p1380_p8, %p1374_p5 }
  0x35   :  { %1384 = shalt.err (!%p1381_p9)
}
  0x36   :  { %60 = dma.hbm_to_vmem [thread:$0]  %s1657_s4, 1024, %s55_s14, [#allocation10], %s1463_s18, %s1463_s18, %s1464_s19  }
  0x37   :  { %s1467_s24 = smov [#allocation14]   ;;  %s969_s26 = sshll.u32 %s24_s9, 6 }
  0x38   :  { %s78_s25 = sshll.u32 %s1467_s24, 4  ;;  %s29_s29 = scalar_lea.hbm %s1655_s2, %s969_s26  ;;  %s1570_s25 = int_to_ptr.vmem [resolvable:$true] %s78_s25 }
  0x39   :  { %s1385_s3 = scalar_lea.hbm %s29_s29, 1024  ;;  %s1387_s13 = scalar_lea.hbm %s1655_s2, 1024 }
  0x3a   :  { %p1386_p10 = scmp.ne.s32.totalorder %s29_s29, %s1385_s3  ;;  %p1388_p11 = scmp.lt.u32.totalorder %s29_s29, %s1655_s2 }
  0x3b   :  { %p1389_p12 = scmp.lt.u32.totalorder %s1387_s13, %s1385_s3  ;;  %p1391_p0 = scmp.lt.u32.totalorder %s1385_s3, %s29_s29 }
  0x3d   :  { %p1390_p13 = por %p1389_p12, %p1388_p11 }
  0x3f   :  { %p1392_p1 = por %p1391_p0, %p1390_p13 }
  0x41   :  { %p1393_p2 = pnand %p1392_p1, %p1386_p10 }
  0x43   :  { %1396 = shalt.err (!%p1393_p2)
}
  0x44   :  { %s1397_s4 = scalar_lea.vmem %s31_s12, 1024  ;;  %p1402_p4 = scmp.lt.s32.totalorder %s31_s12, %s31_s12 }
  0x45   :  { %p1398_p3 = scmp.ne.s32.totalorder %s31_s12, %s1397_s4  ;;  %p1403_p5 = scmp.lt.s32.totalorder %s1397_s4, %s1397_s4 }
  0x47   :  { %p1404_p6 = por %p1403_p5, %p1402_p4 }
  0x49   :  { %p1405_p7 = pnand %p1404_p6, %p1398_p3 }
  0x4b   :  { %1408 = shalt.err (!%p1405_p7)
}
  0x4c   :  { %36 = dma.hbm_to_vmem [thread:$0]  %s29_s29, 1024, %s31_s12, [#allocation7], %s1463_s18, %s1463_s18, %s1464_s19  }
  0x4d   :  { %s1409_s2 = scalar_lea.hbm %s1659_s6, 1024 }
  0x4e   :  { %p1410_p8 = scmp.ne.s32.totalorder %s1659_s6, %s1409_s2  ;;  %p1413_p9 = scmp.lt.u32.totalorder %s1409_s2, %s1659_s6 }
  0x50   :  { %p1415_p10 = pnand %p1413_p9, %p1410_p8 }
  0x52   :  { %1418 = shalt.err (!%p1415_p10)
}
  0x53   :  { %s1419_s22 = scalar_lea.vmem %s1570_s25, 1024  ;;  %p1424_p12 = scmp.lt.s32.totalorder %s1570_s25, %s1570_s25 }
  0x54   :  { %p1420_p11 = scmp.ne.s32.totalorder %s1570_s25, %s1419_s22  ;;  %p1425_p13 = scmp.lt.s32.totalorder %s1419_s22, %s1419_s22 }
  0x56   :  { %p1426_p0 = por %p1425_p13, %p1424_p12 }
  0x58   :  { %p1427_p1 = pnand %p1426_p0, %p1420_p11 }
  0x5a   :  { %1430 = shalt.err (!%p1427_p1)
}
  0x5b   :  { %84 = dma.hbm_to_vmem [thread:$0]  %s1659_s6, 1024, %s1570_s25, [#allocation13], %s1463_s18, %s1463_s18, %s1464_s19  }
  0x5c   :  { %1453 = dma.done.wait [#allocation7], 1024  }
  0x5d   :  { %1454 = vsyncadd [#allocation7], 4294966272 }
  0x5e   :  { %1455 = dma.done.wait [#allocation10], 2048  }
  0x5f   :  { %1456 = vsyncadd [#allocation10], 4294965248 }
  0x60   :  { %1457 = dma.done.wait [#allocation13], 2048  }
  0x61   :  { %1458 = vsyncadd [#allocation13], 4294965248  ;;  %v1468_v0 = vmov 0.0   ;;  %p971_p2 = scmp.le.s32.totalorder %s1654_s1, 0 }
  0x62   :  { %111 = vst [vmem:[#allocation2] sm:$0xff] %v1468_v0  ;;  %112 = vst [vmem:[#allocation2 + $0x8] sm:$0xff] %v1468_v0  ;;  %s135_s23 = sld [smem:[#allocation4]] (!%p971_p2)  ;;  %v1287_v1 = vld [vmem:[#allocation6] sm:$0xff] (!%p971_p2)   ;;  %v1289_v11 = vld [vmem:[#allocation6 + $0x8] sm:$0xff] (!%p971_p2)  }
  0x63   :  { %113 = vst [vmem:[#allocation2 + $0x10] sm:$0xff] %v1468_v0  ;;  %114 = vst [vmem:[#allocation2 + $0x18] sm:$0xff] %v1468_v0  ;;  %131 = sbr.rel (%p971_p2) target bundleno = 367 (0x16f), region = 53  ;;  %v1288_v2 = vld [vmem:[#allocation6 + $0x20] sm:$0xff] (!%p971_p2)   ;;  %1158 = vmatprep.mubr.bf16.mxu0 (!%p971_p2), %v1287_v1  ;;  %v1290_v12 = vld [vmem:[#allocation6 + $0x28] sm:$0xff] (!%p971_p2)  }
  0x64   :  { %115 = vst [vmem:[#allocation2 + $0x20] sm:$0xff] %v1468_v0  ;;  %116 = vst [vmem:[#allocation2 + $0x28] sm:$0xff] %v1468_v0  ;;  %1166 = vmatprep.mubr.bf16.mxu1 (!%p971_p2), %v1288_v2  ;;  %v1291_v13 = vld [vmem:[#allocation6 + $0x10] sm:$0xff] (!%p971_p2)   ;;  %v1293_v15 = vld [vmem:[#allocation6 + $0x18] sm:$0xff] (!%p971_p2)  }
  0x65   :  { %117 = vst [vmem:[#allocation2 + $0x30] sm:$0xff] %v1468_v0  ;;  %118 = vst [vmem:[#allocation2 + $0x38] sm:$0xff] %v1468_v0  ;;  %v1292_v14 = vld [vmem:[#allocation6 + $0x30] sm:$0xff] (!%p971_p2)   ;;  %v1294_v16 = vld [vmem:[#allocation6 + $0x38] sm:$0xff] (!%p971_p2)  }
  0x66   :  { %119 = vst [vmem:[#allocation2 + $0x40] sm:$0xff] %v1468_v0  ;;  %120 = vst [vmem:[#allocation2 + $0x48] sm:$0xff] %v1468_v0 }
  0x67   :  { %121 = vst [vmem:[#allocation2 + $0x50] sm:$0xff] %v1468_v0  ;;  %122 = vst [vmem:[#allocation2 + $0x58] sm:$0xff] %v1468_v0 }
  0x68   :  { %123 = vst [vmem:[#allocation2 + $0x60] sm:$0xff] %v1468_v0  ;;  %124 = vst [vmem:[#allocation2 + $0x68] sm:$0xff] %v1468_v0  ;;  %s972_s24 = sshll.u32 (!%p971_p2), %s135_s23, 7 }
  0x69   :  { %125 = vst [vmem:[#allocation2 + $0x70] sm:$0xff] %v1468_v0  ;;  %126 = vst [vmem:[#allocation2 + $0x78] sm:$0xff] %v1468_v0  ;;  %s137_s25 = sshra.s32 (!%p971_p2), %s972_s24, 3  ;;  %v157_v19 = vld [vmem:[#allocation2] sm:$0xff] (!%p971_p2)  ;;  %v158_v29 = vld [vmem:[#allocation2 + $0x8] sm:$0xff] (!%p971_p2) }
  0x6a   :  { %s973_s26 = sshll.u32 %s137_s25, 2  ;;  %v159_v17 = vld [vmem:[#allocation2 + $0x10] sm:$0xff]  ;;  %v160_v23 = vld [vmem:[#allocation2 + $0x18] sm:$0xff] }
  0x6b   :  { %s1607_s27 = scalar_lea.vmem [#allocation9], %s973_s26  ;;  %v161_v43 = vld [vmem:[#allocation2 + $0x20] sm:$0xff]  ;;  %v162_v53 = vld [vmem:[#allocation2 + $0x28] sm:$0xff] }
  0x6c   :  { %v1279_v3 = vld [vmem:[%s1607_s27] sm:$0xff]   ;;  %v1280_v4 = vld [vmem:[%s1607_s27 + $0x8] sm:$0xff]   ;;  %v1281_v5 = vld [vmem:[%s1607_s27 + $0x10] sm:$0xff]  }
  0x6d   :  { %1142 = vmatprep.subr.bf16.mxu0 %v1279_v3  ;;  %1238 = vmatprep.subr.bf16.mxu1 %v1279_v3  ;;  %v1282_v6 = vld [vmem:[%s1607_s27 + $0x18] sm:$0xff]   ;;  %v1283_v7 = vld [vmem:[%s1607_s27 + $0x20] sm:$0xff]   ;;  %v1284_v8 = vld [vmem:[%s1607_s27 + $0x28] sm:$0xff]  }
  0x6e   :  { %1143 = vmatpush3.bf16.msra.mxu0 %v1279_v3  ;;  %1246 = vmatpush3.bf16.msra.mxu1 %v1279_v3  ;;  %v1285_v9 = vld [vmem:[%s1607_s27 + $0x30] sm:$0xff]   ;;  %v1286_v10 = vld [vmem:[%s1607_s27 + $0x38] sm:$0xff]   ;;  %v165_v20 = vld [vmem:[#allocation2 + $0x40] sm:$0xff] }
  0x6f   :  { %1144 = vmatprep.subr.bf16.mxu0 %v1280_v4  ;;  %1239 = vmatprep.subr.bf16.mxu1 %v1280_v4  ;;  %v167_v18 = vld [vmem:[#allocation2 + $0x50] sm:$0xff]  ;;  %v168_v24 = vld [vmem:[#allocation2 + $0x58] sm:$0xff]  ;;  %v166_v30 = vld [vmem:[#allocation2 + $0x48] sm:$0xff] }
  0x70   :  { %v163_v41 = vld [vmem:[#allocation2 + $0x30] sm:$0xff]  ;;  %v169_v44 = vld [vmem:[#allocation2 + $0x60] sm:$0xff]  ;;  %v164_v47 = vld [vmem:[#allocation2 + $0x38] sm:$0xff] }
  0x71   :  { %v171_v42 = vld [vmem:[#allocation2 + $0x70] sm:$0xff]  ;;  %v172_v48 = vld [vmem:[#allocation2 + $0x78] sm:$0xff]  ;;  %v170_v54 = vld [vmem:[#allocation2 + $0x68] sm:$0xff] }
  0x72   :  { %1145 = vmatpush3.bf16.msra.mxu0 %v1280_v4  ;;  %1247 = vmatpush3.bf16.msra.mxu1 %v1280_v4 }
  0x73   :  { %1146 = vmatprep.subr.bf16.mxu0 %v1281_v5  ;;  %1240 = vmatprep.subr.bf16.mxu1 %v1281_v5 }
  0x76   :  { %1147 = vmatpush3.bf16.msra.mxu0 %v1281_v5  ;;  %1248 = vmatpush3.bf16.msra.mxu1 %v1281_v5 }
  0x77   :  { %1148 = vmatprep.subr.bf16.mxu0 %v1282_v6  ;;  %1241 = vmatprep.subr.bf16.mxu1 %v1282_v6 }
  0x7a   :  { %1149 = vmatpush3.bf16.msra.mxu0 %v1282_v6  ;;  %1249 = vmatpush3.bf16.msra.mxu1 %v1282_v6 }
  0x7b   :  { %1150 = vmatprep.subr.bf16.mxu0 %v1283_v7  ;;  %1242 = vmatprep.subr.bf16.mxu1 %v1283_v7 }
  0x7e   :  { %1151 = vmatpush3.bf16.msra.mxu0 %v1283_v7  ;;  %1250 = vmatpush3.bf16.msra.mxu1 %v1283_v7 }
  0x7f   :  { %1152 = vmatprep.subr.bf16.mxu0 %v1284_v8  ;;  %1243 = vmatprep.subr.bf16.mxu1 %v1284_v8 }
  0x82   :  { %1153 = vmatpush3.bf16.msra.mxu0 %v1284_v8  ;;  %1251 = vmatpush3.bf16.msra.mxu1 %v1284_v8 }
  0x83   :  { %1154 = vmatprep.subr.bf16.mxu0 %v1285_v9  ;;  %1244 = vmatprep.subr.bf16.mxu1 %v1285_v9 }
  0x86   :  { %1155 = vmatpush3.bf16.msra.mxu0 %v1285_v9  ;;  %1252 = vmatpush3.bf16.msra.mxu1 %v1285_v9 }
  0x87   :  { %1156 = vmatprep.subr.bf16.mxu0 %v1286_v10  ;;  %1245 = vmatprep.subr.bf16.mxu1 %v1286_v10 }
  0x8a   :  { %1157 = vmatpush3.bf16.msra.mxu0 %v1286_v10  ;;  %1253 = vmatpush3.bf16.msra.mxu1 %v1286_v10 }
  0x8d   :  { %1159 = vmatmul.mubr.bf16.vlgmr.msra.gmra.mrb[0].mxu0 %v1289_v11  ;;  %1167 = vmatmul.mubr.bf16.vlgmr.msra.gmra.mrb[0].mxu1 %v1290_v12 }
  0x8e   :  { %1162 = vmatprep.mubr.bf16.mxu0 %v1291_v13  ;;  %1170 = vmatprep.mubr.bf16.mxu1 %v1292_v14 }
  0x95   :  { %1163 = vmatmul.mubr.bf16.gmra.mrb[4].mxu0 %v1293_v15  ;;  %1171 = vmatmul.mubr.bf16.gmra.mrb[4].mxu1 %v1294_v16 }
 0x160   :  { %v1160_v21 = vpop.f32.mrb[0].mxu0  ;;  %v1168_v22 = vpop.f32.mrb[0].mxu1 }
 0x161   :  { %v384_v25 = vadd.f32 %v1160_v21, %v159_v17  ;;  %v392_v26 = vadd.f32 %v1168_v22, %v167_v18  ;;  %v319_v27 = vpop.f32.mrb[1].mxu0  ;;  %v351_v28 = vpop.f32.mrb[1].mxu1 }
 0x162   :  { %v382_v31 = vadd.f32 %v319_v27, %v157_v19  ;;  %v390_v32 = vadd.f32 %v351_v28, %v165_v20  ;;  %v1161_v33 = vpop.f32.mrb[2].mxu0  ;;  %v1169_v34 = vpop.f32.mrb[2].mxu1 }
 0x163   :  { %400 = vst [vmem:[#allocation2 + $0x10] sm:$0xff] %v384_v25  ;;  %408 = vst [vmem:[#allocation2 + $0x50] sm:$0xff] %v392_v26  ;;  %v385_v35 = vadd.f32 %v1161_v33, %v160_v23  ;;  %v393_v36 = vadd.f32 %v1169_v34, %v168_v24  ;;  %v322_v37 = vpop.f32.mrb[3].mxu0  ;;  %v354_v38 = vpop.f32.mrb[3].mxu1 }
 0x164   :  { %398 = vst [vmem:[#allocation2] sm:$0xff] %v382_v31  ;;  %406 = vst [vmem:[#allocation2 + $0x40] sm:$0xff] %v390_v32  ;;  %v383_v39 = vadd.f32 %v322_v37, %v158_v29  ;;  %v391_v40 = vadd.f32 %v354_v38, %v166_v30 }
 0x165   :  { %401 = vst [vmem:[#allocation2 + $0x18] sm:$0xff] %v385_v35  ;;  %409 = vst [vmem:[#allocation2 + $0x58] sm:$0xff] %v393_v36 }
 0x166   :  { %399 = vst [vmem:[#allocation2 + $0x8] sm:$0xff] %v383_v39  ;;  %407 = vst [vmem:[#allocation2 + $0x48] sm:$0xff] %v391_v40 }
 0x168   :  { %v1164_v45 = vpop.f32.mrb[4].mxu0  ;;  %v1172_v46 = vpop.f32.mrb[4].mxu1 }
 0x169   :  { %v388_v49 = vadd.f32 %v1164_v45, %v163_v41  ;;  %v396_v50 = vadd.f32 %v1172_v46, %v171_v42  ;;  %v335_v51 = vpop.f32.mrb[5].mxu0  ;;  %v367_v52 = vpop.f32.mrb[5].mxu1 }
 0x16a   :  { %v386_v55 = vadd.f32 %v335_v51, %v161_v43  ;;  %v394_v56 = vadd.f32 %v367_v52, %v169_v44  ;;  %v1165_v57 = vpop.f32.mrb[6].mxu0  ;;  %v1173_v58 = vpop.f32.mrb[6].mxu1 }
 0x16b   :  { %404 = vst [vmem:[#allocation2 + $0x30] sm:$0xff] %v388_v49  ;;  %412 = vst [vmem:[#allocation2 + $0x70] sm:$0xff] %v396_v50  ;;  %v389_v59 = vadd.f32 %v1165_v57, %v164_v47  ;;  %v397_v60 = vadd.f32 %v1173_v58, %v172_v48  ;;  %v338_v61 = vpop.f32.mrb[7].mxu0  ;;  %v370_v62 = vpop.f32.mrb[7].mxu1 }
 0x16c   :  { %402 = vst [vmem:[#allocation2 + $0x20] sm:$0xff] %v386_v55  ;;  %410 = vst [vmem:[#allocation2 + $0x60] sm:$0xff] %v394_v56  ;;  %v387_v63 = vadd.f32 %v338_v61, %v162_v53  ;;  %v395_v0 = vadd.f32 %v370_v62, %v170_v54 }
 0x16d   :  { %405 = vst [vmem:[#allocation2 + $0x38] sm:$0xff] %v389_v59  ;;  %413 = vst [vmem:[#allocation2 + $0x78] sm:$0xff] %v397_v60 }
 0x16e   :  { %403 = vst [vmem:[#allocation2 + $0x28] sm:$0xff] %v387_v63  ;;  %411 = vst [vmem:[#allocation2 + $0x68] sm:$0xff] %v395_v0 }
 0x16f PF:  { %v1295_v1 = vld [vmem:[#allocation14] sm:$0xff]   ;;  %v1297_v3 = vld [vmem:[#allocation14 + $0x8] sm:$0xff]   ;;  %v1299_v5 = vld [vmem:[#allocation14 + $0x10] sm:$0xff]  }
 0x170   :  { %v1296_v2 = vld [vmem:[#allocation12] sm:$0xff]   ;;  %1174 = vmatprep.subr.bf16.mxu1 %v1295_v1  ;;  %v1298_v4 = vld [vmem:[#allocation12 + $0x8] sm:$0xff]   ;;  %v1300_v6 = vld [vmem:[#allocation12 + $0x10] sm:$0xff]  }
 0x171   :  { %1206 = vmatprep.subr.bf16.mxu0 %v1296_v2  ;;  %1175 = vmatpush3.bf16.msra.mxu1 %v1295_v1  ;;  %v1301_v7 = vld [vmem:[#allocation14 + $0x18] sm:$0xff]   ;;  %v1303_v9 = vld [vmem:[#allocation14 + $0x20] sm:$0xff]   ;;  %v1305_v11 = vld [vmem:[#allocation14 + $0x28] sm:$0xff]  }
 0x172   :  { %1207 = vmatpush3.bf16.msra.mxu0 %v1296_v2  ;;  %1176 = vmatprep.subr.bf16.mxu1 %v1297_v3  ;;  %v1302_v8 = vld [vmem:[#allocation12 + $0x18] sm:$0xff]   ;;  %v1304_v10 = vld [vmem:[#allocation12 + $0x20] sm:$0xff]   ;;  %v1306_v12 = vld [vmem:[#allocation12 + $0x28] sm:$0xff]  }
 0x173   :  { %1208 = vmatprep.subr.bf16.mxu0 %v1298_v4  ;;  %v1311_v13 = vld [vmem:[#allocation11] sm:$0xff]   ;;  %v418_v15 = vld [vmem:[#allocation2 + $0x8] sm:$0xff]  ;;  %v1307_v17 = vld [vmem:[#allocation14 + $0x30] sm:$0xff]  }
 0x174   :  { %v417_v14 = vld [vmem:[#allocation2] sm:$0xff]  ;;  %1190 = vmatprep.mubr.bf16.mxu1 %v1311_v13  ;;  %v1308_v18 = vld [vmem:[#allocation12 + $0x30] sm:$0xff]   ;;  %v1309_v19 = vld [vmem:[#allocation14 + $0x38] sm:$0xff]  }
 0x175   :  { %1177 = vmatpush3.bf16.msra.mxu1 %v1297_v3  ;;  %v433_v16 = vpack.c.bf16 %v418_v15, %v417_v14  ;;  %v1310_v20 = vld [vmem:[#allocation12 + $0x38] sm:$0xff]   ;;  %v419_v21 = vld [vmem:[#allocation2 + $0x10] sm:$0xff]  ;;  %v421_v23 = vld [vmem:[#allocation2 + $0x20] sm:$0xff] }
 0x176   :  { %1209 = vmatpush3.bf16.msra.mxu0 %v1298_v4  ;;  %1178 = vmatprep.subr.bf16.mxu1 %v1299_v5  ;;  %v420_v22 = vld [vmem:[#allocation2 + $0x18] sm:$0xff]  ;;  %v422_v24 = vld [vmem:[#allocation2 + $0x28] sm:$0xff]  ;;  %v1313_v27 = vld [vmem:[#allocation11 + $0x10] sm:$0xff]  }
 0x177   :  { %1210 = vmatprep.subr.bf16.mxu0 %v1300_v6  ;;  %1222 = vmatprep.mubr.bf16.mxu0 %v433_v16  ;;  %v1312_v25 = vld [vmem:[#allocation11 + $0x8] sm:$0xff]   ;;  %v434_v26 = vpack.c.bf16 %v420_v22, %v419_v21  ;;  %v435_v28 = vpack.c.bf16 %v422_v24, %v421_v23  ;;  %v423_v29 = vld [vmem:[#allocation2 + $0x30] sm:$0xff]  ;;  %v424_v30 = vld [vmem:[#allocation2 + $0x38] sm:$0xff] }
 0x178   :  { %v425_v31 = vld [vmem:[#allocation2 + $0x40] sm:$0xff]  ;;  %v426_v32 = vld [vmem:[#allocation2 + $0x48] sm:$0xff]  ;;  %v1314_v33 = vld [vmem:[#allocation11 + $0x18] sm:$0xff]   ;;  %v436_v34 = vpack.c.bf16 %v424_v30, %v423_v29 }
 0x179   :  { %1179 = vmatpush3.bf16.msra.mxu1 %v1299_v5  ;;  %v1315_v35 = vld [vmem:[#allocation11 + $0x20] sm:$0xff]   ;;  %v437_v36 = vpack.c.bf16 %v426_v32, %v425_v31  ;;  %v427_v37 = vld [vmem:[#allocation2 + $0x50] sm:$0xff]  ;;  %v428_v38 = vld [vmem:[#allocation2 + $0x58] sm:$0xff] }
 0x17a   :  { %1211 = vmatpush3.bf16.msra.mxu0 %v1300_v6  ;;  %1180 = vmatprep.subr.bf16.mxu1 %v1301_v7  ;;  %v429_v39 = vld [vmem:[#allocation2 + $0x60] sm:$0xff]  ;;  %v430_v40 = vld [vmem:[#allocation2 + $0x68] sm:$0xff]  ;;  %v438_v42 = vpack.c.bf16 %v428_v38, %v427_v37  ;;  %v1317_v43 = vld [vmem:[#allocation11 + $0x30] sm:$0xff]  }
 0x17b   :  { %1212 = vmatprep.subr.bf16.mxu0 %v1302_v8  ;;  %v1316_v41 = vld [vmem:[#allocation11 + $0x28] sm:$0xff]   ;;  %v439_v44 = vpack.c.bf16 %v430_v40, %v429_v39  ;;  %v431_v45 = vld [vmem:[#allocation2 + $0x70] sm:$0xff]  ;;  %v432_v46 = vld [vmem:[#allocation2 + $0x78] sm:$0xff] }
 0x17c   :  { %v1318_v47 = vld [vmem:[#allocation11 + $0x38] sm:$0xff]   ;;  %v440_v48 = vpack.c.bf16 %v432_v46, %v431_v45  ;;  %v1620_v51 = vld [vmem:[%s1660_s7] ss:$0 sm:$0xff]  ;;  %s1469_s7 = smov [#allocation15]  }
 0x17d   :  { %1181 = vmatpush3.bf16.msra.mxu1 %v1301_v7  ;;  %s951_s29 = sshll.u32 %s1469_s7, 4  ;;  %s952_s29 = int_to_ptr.vmem [resolvable:$true] %s951_s29 }
 0x17e   :  { %1213 = vmatpush3.bf16.msra.mxu0 %v1302_v8  ;;  %1182 = vmatprep.subr.bf16.mxu1 %v1303_v9  ;;  %s1431_s3 = scalar_lea.vmem %s952_s29, 1024  ;;  %p1436_p4 = scmp.lt.s32.totalorder %s952_s29, %s952_s29 }
 0x17f   :  { %1214 = vmatprep.subr.bf16.mxu0 %v1304_v10  ;;  %p1432_p3 = scmp.ne.s32.totalorder %s952_s29, %s1431_s3  ;;  %p1437_p5 = scmp.lt.s32.totalorder %s1431_s3, %s1431_s3 }
 0x181   :  { %1183 = vmatpush3.bf16.msra.mxu1 %v1303_v9  ;;  %p1438_p6 = por %p1437_p5, %p1436_p4 }
 0x182   :  { %1215 = vmatpush3.bf16.msra.mxu0 %v1304_v10  ;;  %1184 = vmatprep.subr.bf16.mxu1 %v1305_v11 }
 0x183   :  { %1216 = vmatprep.subr.bf16.mxu0 %v1306_v12  ;;  %p1439_p7 = pnand %p1438_p6, %p1432_p3 }
 0x185   :  { %1185 = vmatpush3.bf16.msra.mxu1 %v1305_v11 }
 0x186   :  { %1217 = vmatpush3.bf16.msra.mxu0 %v1306_v12  ;;  %1186 = vmatprep.subr.bf16.mxu1 %v1307_v17 }
 0x187   :  { %1218 = vmatprep.subr.bf16.mxu0 %v1308_v18 }
 0x189   :  { %1187 = vmatpush3.bf16.msra.mxu1 %v1307_v17 }
 0x18a   :  { %1219 = vmatpush3.bf16.msra.mxu0 %v1308_v18  ;;  %1188 = vmatprep.subr.bf16.mxu1 %v1309_v19 }
 0x18b   :  { %1220 = vmatprep.subr.bf16.mxu0 %v1310_v20 }
 0x18d   :  { %1189 = vmatpush3.bf16.msra.mxu1 %v1309_v19 }
 0x18e   :  { %1221 = vmatpush3.bf16.msra.mxu0 %v1310_v20 }
 0x190   :  { %1191 = vmatmul.mubr.bf16.vlgmr.msra.gmra.mrb[0].mxu1 %v1312_v25 }
 0x191   :  { %1223 = vmatmul.mubr.bf16.vlgmr.msra.gmra.mrb[0].mxu0 %v434_v26  ;;  %1194 = vmatprep.mubr.bf16.mxu1 %v1313_v27 }
 0x192   :  { %1226 = vmatprep.mubr.bf16.mxu0 %v435_v28 }
 0x198   :  { %1195 = vmatmul.mubr.bf16.gmra.mrb[4].mxu1 %v1314_v33 }
 0x199   :  { %1227 = vmatmul.mubr.bf16.gmra.mrb[4].mxu0 %v436_v34  ;;  %1198 = vmatprep.mubr.bf16.mxu1 %v1315_v35 }
 0x19a   :  { %1230 = vmatprep.mubr.bf16.mxu0 %v437_v36 }
 0x1a0   :  { %1199 = vmatmul.mubr.bf16.gmra.mrb[8].mxu1 %v1316_v41 }
 0x1a1   :  { %1231 = vmatmul.mubr.bf16.gmra.mrb[8].mxu0 %v438_v42  ;;  %1202 = vmatprep.mubr.bf16.mxu1 %v1317_v43 }
 0x1a2   :  { %1234 = vmatprep.mubr.bf16.mxu0 %v439_v44 }
 0x1a8   :  { %1203 = vmatmul.mubr.bf16.gmra.mrb[12].mxu1 %v1318_v47 }
 0x1a9   :  { %1235 = vmatmul.mubr.bf16.gmra.mrb[12].mxu0 %v440_v48 }
 0x263   :  { %v1192_v49 = vpop.f32.mrb[0].mxu1 }
 0x264   :  { %v1224_v50 = vpop.f32.mrb[0].mxu0  ;;  %v619_v52 = vpop.f32.mrb[1].mxu1 }
 0x265   :  { %v773_v53 = vadd.f32 %v1224_v50, %v1192_v49  ;;  %v764_v54 = vpop.f32.mrb[1].mxu0  ;;  %v1193_v55 = vpop.f32.mrb[2].mxu1 }
 0x266   :  { %v765_v56 = vadd.f32 %v764_v54, %v619_v52  ;;  %v1225_v57 = vpop.f32.mrb[2].mxu0  ;;  %v622_v58 = vpop.f32.mrb[3].mxu1 }
 0x267   :  { %v836_v59 = vadd.f32 %v1620_v51, %v773_v53  ;;  %v776_v60 = vadd.f32 %v1225_v57, %v1193_v55  ;;  %v767_v61 = vpop.f32.mrb[3].mxu0 }
 0x268   :  { %v834_v62 = vadd.f32 %v1620_v51, %v765_v56  ;;  %v768_v63 = vadd.f32 %v767_v61, %v622_v58 }
 0x269   :  { %v837_v0 = vadd.f32 %v1620_v51, %v776_v60  ;;  %v852_v2 = vmax.f32 %v836_v59, 0.0 }
 0x26a   :  { %v835_v1 = vadd.f32 %v1620_v51, %v768_v63  ;;  %v850_v5 = vmax.f32 %v834_v62, 0.0 }
 0x26b   :  { %v853_v3 = vmax.f32 %v837_v0, 0.0  ;;  %v1196_v4 = vpop.f32.mrb[4].mxu1 }
 0x26c   :  { %v851_v6 = vmax.f32 %v835_v1, 0.0  ;;  %v1228_v7 = vpop.f32.mrb[4].mxu0  ;;  %v635_v8 = vpop.f32.mrb[5].mxu1 }
 0x26d   :  { %v1055_v9 = vpack.c.bf16 %v853_v3, %v852_v2  ;;  %v789_v10 = vadd.f32 %v1228_v7, %v1196_v4  ;;  %v780_v11 = vpop.f32.mrb[5].mxu0  ;;  %v1197_v12 = vpop.f32.mrb[6].mxu1 }
 0x26e   :  { %v1050_v13 = vpack.c.bf16 %v851_v6, %v850_v5  ;;  %v781_v14 = vadd.f32 %v780_v11, %v635_v8  ;;  %v1229_v15 = vpop.f32.mrb[6].mxu0  ;;  %v638_v16 = vpop.f32.mrb[7].mxu1 }
 0x26f   :  { %1087 = vst [vmem:[#allocation15 + $0x8] sm:$0xff] %v1055_v9   ;;  %v840_v17 = vadd.f32 %v1620_v51, %v789_v10  ;;  %v792_v18 = vadd.f32 %v1229_v15, %v1197_v12  ;;  %v783_v19 = vpop.f32.mrb[7].mxu0 }
 0x270   :  { %1051 = vst [vmem:[#allocation15] sm:$0xff] %v1050_v13   ;;  %v838_v20 = vadd.f32 %v1620_v51, %v781_v14  ;;  %v784_v21 = vadd.f32 %v783_v19, %v638_v16 }
 0x271   :  { %v841_v22 = vadd.f32 %v1620_v51, %v792_v18  ;;  %v856_v24 = vmax.f32 %v840_v17, 0.0 }
 0x272   :  { %v839_v23 = vadd.f32 %v1620_v51, %v784_v21  ;;  %v854_v27 = vmax.f32 %v838_v20, 0.0 }
 0x273   :  { %v857_v25 = vmax.f32 %v841_v22, 0.0  ;;  %v1200_v26 = vpop.f32.mrb[8].mxu1 }
 0x274   :  { %v855_v28 = vmax.f32 %v839_v23, 0.0  ;;  %v1232_v29 = vpop.f32.mrb[8].mxu0  ;;  %v651_v30 = vpop.f32.mrb[9].mxu1 }
 0x275   :  { %v1065_v31 = vpack.c.bf16 %v857_v25, %v856_v24  ;;  %v805_v32 = vadd.f32 %v1232_v29, %v1200_v26  ;;  %v796_v33 = vpop.f32.mrb[9].mxu0  ;;  %v1201_v34 = vpop.f32.mrb[10].mxu1 }
 0x276   :  { %v1060_v35 = vpack.c.bf16 %v855_v28, %v854_v27  ;;  %v797_v36 = vadd.f32 %v796_v33, %v651_v30  ;;  %v1233_v37 = vpop.f32.mrb[10].mxu0  ;;  %v654_v38 = vpop.f32.mrb[11].mxu1 }
 0x277   :  { %1089 = vst [vmem:[#allocation15 + $0x18] sm:$0xff] %v1065_v31   ;;  %v844_v39 = vadd.f32 %v1620_v51, %v805_v32  ;;  %v808_v40 = vadd.f32 %v1233_v37, %v1201_v34  ;;  %v799_v41 = vpop.f32.mrb[11].mxu0 }
 0x278   :  { %1088 = vst [vmem:[#allocation15 + $0x10] sm:$0xff] %v1060_v35   ;;  %v842_v42 = vadd.f32 %v1620_v51, %v797_v36  ;;  %v800_v43 = vadd.f32 %v799_v41, %v654_v38 }
 0x279   :  { %v845_v44 = vadd.f32 %v1620_v51, %v808_v40  ;;  %v860_v46 = vmax.f32 %v844_v39, 0.0 }
 0x27a   :  { %v843_v45 = vadd.f32 %v1620_v51, %v800_v43  ;;  %v858_v49 = vmax.f32 %v842_v42, 0.0 }
 0x27b   :  { %v861_v47 = vmax.f32 %v845_v44, 0.0  ;;  %v1204_v48 = vpop.f32.mrb[12].mxu1 }
 0x27c   :  { %v859_v50 = vmax.f32 %v843_v45, 0.0  ;;  %v1236_v52 = vpop.f32.mrb[12].mxu0  ;;  %v667_v53 = vpop.f32.mrb[13].mxu1 }
 0x27d   :  { %v1075_v54 = vpack.c.bf16 %v861_v47, %v860_v46  ;;  %v821_v55 = vadd.f32 %v1236_v52, %v1204_v48  ;;  %v812_v56 = vpop.f32.mrb[13].mxu0  ;;  %v1205_v57 = vpop.f32.mrb[14].mxu1 }
 0x27e   :  { %v1070_v58 = vpack.c.bf16 %v859_v50, %v858_v49  ;;  %v813_v59 = vadd.f32 %v812_v56, %v667_v53  ;;  %v1237_v60 = vpop.f32.mrb[14].mxu0  ;;  %v670_v61 = vpop.f32.mrb[15].mxu1 }
 0x27f   :  { %1091 = vst [vmem:[#allocation15 + $0x28] sm:$0xff] %v1075_v54   ;;  %v848_v62 = vadd.f32 %v1620_v51, %v821_v55  ;;  %v824_v63 = vadd.f32 %v1237_v60, %v1205_v57  ;;  %v815_v0 = vpop.f32.mrb[15].mxu0 }
 0x280   :  { %1090 = vst [vmem:[#allocation15 + $0x20] sm:$0xff] %v1070_v58   ;;  %v846_v1 = vadd.f32 %v1620_v51, %v813_v59  ;;  %v816_v2 = vadd.f32 %v815_v0, %v670_v61 }
 0x281   :  { %v849_v3 = vadd.f32 %v1620_v51, %v824_v63  ;;  %v864_v5 = vmax.f32 %v848_v62, 0.0 }
 0x282   :  { %v847_v4 = vadd.f32 %v1620_v51, %v816_v2  ;;  %v862_v7 = vmax.f32 %v846_v1, 0.0 }
 0x283   :  { %v865_v6 = vmax.f32 %v849_v3, 0.0 }
 0x284   :  { %v863_v8 = vmax.f32 %v847_v4, 0.0 }
 0x285   :  { %v1085_v9 = vpack.c.bf16 %v865_v6, %v864_v5 }
 0x286   :  { %v1080_v10 = vpack.c.bf16 %v863_v8, %v862_v7 }
 0x287   :  { %1093 = vst [vmem:[#allocation15 + $0x38] sm:$0xff] %v1085_v9  }
 0x288   :  { %1092 = vst [vmem:[#allocation15 + $0x30] sm:$0xff] %v1080_v10  }
 0x289   :  { %1442 = shalt.err (!%p1439_p7)
}
 0x28a   :  { %s1443_s13 = scalar_lea.hbm %s1661_s8, 1024 }
 0x28b   :  { %p1444_p8 = scmp.ne.s32.totalorder %s1661_s8, %s1443_s13  ;;  %p1447_p9 = scmp.lt.u32.totalorder %s1443_s13, %s1661_s8 }
 0x28d   :  { %p1449_p10 = pnand %p1447_p9, %p1444_p8 }
 0x28f   :  { %1452 = shalt.err (!%p1449_p10)
}
 0x290   :  { %957 = dma.vmem_to_hbm [thread:$0]  %s952_s29, 1024, %s1661_s8, [#allocation8], %s1463_s18, %s1463_s18, %s1464_s19  }
 0x291   :  { %1459 = dma.done.wait [#allocation8], 1024  }
 0x292   :  { %1460 = vsyncadd [#allocation8], 4294966272 }
 0x293   :  { %961 = vsyncpa [#allocation7], 1 }
 0x294   :  { %962 = vsyncpa [#allocation10], 1 }
 0x295   :  { %963 = vsyncpa [#allocation13], 1 }
 0x296   :  { %964 = vsyncpa [#allocation8], 1 }

</bundles_post_ra>
